<compile_context>
chip_gen: v6e
topology: v6e:2x2x1
jax: 0.10.0
libtpu: 0.0.40
codegen_flags: <defaults>
</compile_context>

<pallas_src>
import functools

import numpy as np
import jax
import jax.numpy as jnp
from jax.experimental import pallas as pl
from jax.experimental.pallas import tpu as pltpu


def _deconv_bn_relu_kernel(x_ref, w_ref, b_ref, o_ref):
    # x_ref: (TM, Cin)      coarse voxel rows, channels-last
    # w_ref: (Cin, 8*Cout)  folded parity weights (BN already folded in)
    # b_ref: (1, 8*Cout)    folded bias, f32
    # o_ref: (TM, 8*Cout)   lane-dense output block
    acc = jnp.dot(x_ref[...], w_ref[...], preferred_element_type=jnp.float32)
    o_ref[...] = jnp.maximum(acc + b_ref[...], 0.0).astype(o_ref.dtype)


def _round_up(x, k):
    return (x + k - 1) // k * k


def _vmem_limit_bytes():
    # Per-chip scoped-VMEM budget: ~3/4 of physical VMEM, capped at 100 MiB
    # (v5e/v6e: 128 MiB -> 96 MiB; v7x: 64 MiB -> 48 MiB).
    try:
        cap = int(pltpu.get_tpu_info().vmem_capacity_bytes)
    except Exception:
        cap = 64 * 1024 * 1024
    return int(min(cap * 3 // 4, 100 * 1024 * 1024))


def _pick_tile_rows(m, cin, n_cols, in_itemsize, out_itemsize, vmem_limit):
    # Size TM from the per-chip VMEM budget (double-buffered in + out blocks),
    # leaving ~half the limit as headroom for weights / compiler scratch.
    budget = max(vmem_limit // 2, 2 * 1024 * 1024)
    per_row = 2 * (cin * in_itemsize + n_cols * out_itemsize)
    tm = min(int(budget // max(per_row, 1)), 8192)
    # Ensure >= ~4 M-blocks so both v7x TCs / the software pipeline have work.
    tm = min(tm, _round_up(-(-m // 4), 8))
    tm = max(8, (tm // 8) * 8)
    return tm


def fold_batchnorm(w, b, bn_params, eps=1e-5):
    """Fold eval-mode BatchNorm3d into the ConvTranspose3d weight/bias."""
    gamma, beta, running_mean, running_var = bn_params
    scale = gamma / jnp.sqrt(running_var + eps)                    # (Cout,)
    w = w * scale[None, :, None, None, None]
    b = (b - running_mean) * scale + beta
    return w, b


def upsampling_deconv_forward(x_ncdhw, w, b, bn_params=None, *,
                              bn_eps=1e-5,
                              compute_dtype=jnp.float32,
                              out_dtype=jnp.float32):
    """ReLU(BN_eval(ConvTranspose3d(k=2, stride=2, pad=0)(x))); NCDHW in/out.

    w: (Cin, Cout, 2, 2, 2) in PyTorch ConvTranspose3d layout.  b: (Cout,).
    bn_params: optional (gamma, beta, running_mean, running_var), each (Cout,).
    """
    n, cin, d, h, wd = x_ncdhw.shape
    assert w.shape[0] == cin and w.shape[2:] == (2, 2, 2)
    cout = w.shape[1]

    w = w.astype(jnp.float32)
    b = b.astype(jnp.float32)
    if bn_params is not None:
        w, b = fold_batchnorm(w, b, bn_params, eps=bn_eps)

    # Fold the 2x2x2 output-parity taps into the N dimension of ONE matrix:
    #   wmat[ci, ((kd*2+kh)*2+kw)*Cout + co] = w[ci, co, kd, kh, kw]
    n_cols = 8 * cout
    wmat = jnp.transpose(w, (0, 2, 3, 4, 1)).reshape(cin, n_cols)
    bvec = jnp.tile(b, 8).reshape(1, n_cols)

    # Coarse tensor, channels-last, flattened to M voxel rows.
    m = d * h * wd
    xt = jnp.transpose(x_ncdhw, (0, 2, 3, 4, 1)).reshape(n, m, cin)

    vmem_limit = _vmem_limit_bytes()
    tm = _pick_tile_rows(m, cin, n_cols,
                         jnp.dtype(compute_dtype).itemsize,
                         jnp.dtype(out_dtype).itemsize, vmem_limit)
    m_pad = _round_up(m, tm)
    if m_pad != m:                           # ragged tail -> cheap zero pad
        xt = jnp.pad(xt, ((0, 0), (0, m_pad - m), (0, 0)))

    xt = xt.astype(compute_dtype)            # bf16 ingest halves DMA bytes
    wmat = wmat.astype(compute_dtype)
    bvec = bvec.astype(jnp.float32)          # added to the f32 accumulator

    out = pl.pallas_call(
        _deconv_bn_relu_kernel,
        out_shape=jax.ShapeDtypeStruct((n, m_pad, n_cols), out_dtype),
        grid=(n, m_pad // tm),
        in_specs=[
            pl.BlockSpec((None, tm, cin), lambda i, j: (i, j, 0)),
            pl.BlockSpec((cin, n_cols), lambda i, j: (0, 0)),
            pl.BlockSpec((1, n_cols), lambda i, j: (0, 0)),
        ],
        out_specs=pl.BlockSpec((None, tm, n_cols), lambda i, j: (i, j, 0)),
        compiler_params=pltpu.CompilerParams(
            dimension_semantics=("parallel", "parallel"),
            vmem_limit_bytes=vmem_limit),
    )(xt, wmat, bvec)

    # Parity interleave + NDHWC -> NCDHW in ONE XLA transpose.
    out = out[:, :m].reshape(n, d, h, wd, 2, 2, 2, cout)
    out = jnp.transpose(out, (0, 7, 1, 4, 2, 5, 3, 6))
    return out.reshape(n, cout, 2 * d, 2 * h, 2 * wd)


# ---------------------------------------------------------------------------
# Pure-JAX reference (no Pallas) for the correctness check.
# ---------------------------------------------------------------------------
def reference_forward(x_ncdhw, w, b, bn_params=None, bn_eps=1e-5):
    n, cin, d, h, wd = x_ncdhw.shape
    cout = w.shape[1]
    # ConvTranspose3d(k=2, s=2, p=0):
    #   out[n, co, 2d+kd, 2h+kh, 2w+kw] = sum_ci x[n,ci,d,h,w] * w[ci,co,kd,kh,kw]
    y = jnp.einsum('ncdhw,coijk->ndhwijko', x_ncdhw, w)
    y = jnp.transpose(y, (0, 7, 1, 4, 2, 5, 3, 6)).reshape(
        n, cout, 2 * d, 2 * h, 2 * wd)
    y = y + b.reshape(1, cout, 1, 1, 1)
    if bn_params is not None:
        gamma, beta, mean, var = bn_params
        y = (y - mean.reshape(1, cout, 1, 1, 1)) / jnp.sqrt(
            var.reshape(1, cout, 1, 1, 1) + bn_eps)
        y = y * gamma.reshape(1, cout, 1, 1, 1) + beta.reshape(1, cout, 1, 1, 1)
    return jax.nn.relu(y)


if __name__ == "__main__":
    key = jax.random.PRNGKey(0)
    k_x, k_w, k_b, k_g, k_be, k_m, k_v = jax.random.split(key, 7)

    n_filters_in, n_filters_out = 4, 8
    # PyTorch layout NCDHW; coarse spatial 8 -> upsampled to 16
    x = jax.random.normal(k_x, (2, n_filters_in, 8, 8, 8), dtype=jnp.float32)

    fan_in = n_filters_in * 2 * 2 * 2
    bound = 1.0 / np.sqrt(fan_in)
    w = jax.random.uniform(k_w, (n_filters_in, n_filters_out, 2, 2, 2),
                           jnp.float32, -bound, bound)   # (Cin, Cout, kd, kh, kw)
    b = jax.random.uniform(k_b, (n_filters_out,), jnp.float32, -bound, bound)

    # Eval-mode BatchNorm3d parameters (VNet default normalization='batchnorm').
    gamma = jax.random.uniform(k_g, (n_filters_out,), jnp.float32, 0.5, 1.5)
    beta = 0.1 * jax.random.normal(k_be, (n_filters_out,), jnp.float32)
    running_mean = 0.1 * jax.random.normal(k_m, (n_filters_out,), jnp.float32)
    running_var = jax.random.uniform(k_v, (n_filters_out,), jnp.float32, 0.5, 1.5)
    bn = (gamma, beta, running_mean, running_var)

    # f32 path (tight correctness check)
    fwd = jax.jit(upsampling_deconv_forward)
    y = fwd(x, w, b, bn)
    jax.block_until_ready(y)
    y_ref = reference_forward(x, w, b, bn)
    np.testing.assert_allclose(np.asarray(y), np.asarray(y_ref),
                               rtol=1e-4, atol=1e-5)

    # bf16-ingest path (halved DMA / VMEM footprint; f32 accumulation)
    fwd_bf16 = jax.jit(functools.partial(upsampling_deconv_forward,
                                         compute_dtype=jnp.bfloat16))
    y16 = fwd_bf16(x, w, b, bn)
    jax.block_until_ready(y16)
    np.testing.assert_allclose(np.asarray(y16), np.asarray(y_ref),
                               rtol=2e-2, atol=2e-2)

    print("KERNEL_OK")
</pallas_src>

<mosaic_0001>
module attributes {stable_mosaic.version = 11 : i64} {
  func.func @_deconv_bn_relu_kernel(%arg0: i32, %arg1: i32, %arg2: memref<1x128x4xf32, #tpu.memory_space<vmem>>, %arg3: memref<4x64xf32, #tpu.memory_space<vmem>>, %arg4: memref<1x64xf32, #tpu.memory_space<vmem>>, %arg5: memref<1x128x64xf32, #tpu.memory_space<vmem>>) attributes {dimension_semantics = [#tpu.dimension_semantics<parallel>, #tpu.dimension_semantics<parallel>], iteration_bounds = array<i64: 2, 4>, scalar_prefetch = 0 : i64, scratch_operands = 0 : i64, tpu.core_type = #tpu.core_type<tc>, window_params = [{transform_indices = @transform_0, window_bounds = array<i64: 1, 128, 4>}, {pipeline_mode = #tpu.pipeline_mode<synchronous>, transform_indices = @transform_1, window_bounds = array<i64: 4, 64>}, {pipeline_mode = #tpu.pipeline_mode<synchronous>, transform_indices = @transform_2, window_bounds = array<i64: 1, 64>}, {transform_indices = @transform_3, window_bounds = array<i64: 1, 128, 64>}]} {
    %c0 = arith.constant 0 : index
    %c0_0 = arith.constant 0 : index
    %c0_1 = arith.constant 0 : index
    %0 = vector.load %arg2[%c0, %c0_0, %c0_1] : memref<1x128x4xf32, #tpu.memory_space<vmem>>, vector<1x128x4xf32>
    %1 = vector.shape_cast %0 : vector<1x128x4xf32> to vector<128x4xf32>
    %c0_2 = arith.constant 0 : index
    %c0_3 = arith.constant 0 : index
    %2 = vector.load %arg3[%c0_2, %c0_3] : memref<4x64xf32, #tpu.memory_space<vmem>>, vector<4x64xf32>
    %cst = arith.constant dense<0.000000e+00> : vector<128x64xf32>
    %3 = tpu.matmul %1, %2, %cst {dimension_numbers = #tpu.dot_dimension_numbers<[1], [0], [0], [1], [0, 0, 1, 1], [], []>} : vector<128x4xf32>, vector<4x64xf32>, vector<128x64xf32> -> vector<128x64xf32>
    %c0_4 = arith.constant 0 : index
    %c0_5 = arith.constant 0 : index
    %4 = vector.load %arg4[%c0_4, %c0_5] : memref<1x64xf32, #tpu.memory_space<vmem>>, vector<1x64xf32>
    %5 = vector.broadcast %4 : vector<1x64xf32> to vector<128x64xf32>
    %6 = arith.addf %3, %5 : vector<128x64xf32>
    %cst_6 = arith.constant 0.000000e+00 : f32
    %7 = vector.broadcast %cst_6 : f32 to vector<128x64xf32>
    %8 = arith.maximumf %6, %7 : vector<128x64xf32>
    %c0_7 = arith.constant 0 : index
    %c0_8 = arith.constant 0 : index
    %c0_9 = arith.constant 0 : index
    %9 = vector.load %arg5[%c0_7, %c0_8, %c0_9] : memref<1x128x64xf32, #tpu.memory_space<vmem>>, vector<1x128x64xf32>
    %10 = vector.shape_cast %9 : vector<1x128x64xf32> to vector<128x64xf32>
    %11 = vector.shape_cast %8 : vector<128x64xf32> to vector<1x128x64xf32>
    tpu.vector_store %arg5[%c0_7, %c0_8, %c0_9], %11 {strides = array<i32>} : memref<1x128x64xf32, #tpu.memory_space<vmem>>, vector<1x128x64xf32>,
    return
  }
  func.func @transform_0(%arg0: i32, %arg1: i32) -> (i32, i32, i32) {
    %c0_i32 = arith.constant 0 : i32
    %c0_i32_0 = arith.constant 0 : i32
    return %arg0, %arg1, %c0_i32 : i32, i32, i32
  }
  func.func @transform_1(%arg0: i32, %arg1: i32) -> (i32, i32) {
    %c0_i32 = arith.constant 0 : i32
    %c0_i32_0 = arith.constant 0 : i32
    %c0_i32_1 = arith.constant 0 : i32
    return %c0_i32, %c0_i32_0 : i32, i32
  }
  func.func @transform_2(%arg0: i32, %arg1: i32) -> (i32, i32) {
    %c0_i32 = arith.constant 0 : i32
    %c0_i32_0 = arith.constant 0 : i32
    %c0_i32_1 = arith.constant 0 : i32
    return %c0_i32, %c0_i32_0 : i32, i32
  }
  func.func @transform_3(%arg0: i32, %arg1: i32) -> (i32, i32, i32) {
    %c0_i32 = arith.constant 0 : i32
    %c0_i32_0 = arith.constant 0 : i32
    return %arg0, %arg1, %c0_i32 : i32, i32, i32
  }
}

</mosaic_0001>

<bundles_post_ra>
// kernel: tile.9
= control target key start
LH: loop header
LB: loop body
LE: loop exit
PB: predicated region body
PF: predicated region fallthrough
CT: control target
= control target key end

     0   :  { %s69_s10 = smov 56   ;;  %s70_s11 = smov 40   ;;  %vm3_vm0 = vcmask 64512   ;;  %vm9_vm1 = vcmask 523712   ;;  %vm15_vm2 = vcmask 458112   ;;  %vm21_vm3 = vcmask 392512   ;;  %s113_s0 = inlined_call_operand.vmem [shape: f32[8,8], index: 0, kind: input, shape index: {}]   ;;  %s114_s1 = inlined_call_operand.vmem [shape: f32[1,64], index: 1, kind: output, shape index: {}]  }
   0x1   :  { %v55_v0 = vld [vmem:[%s113_s0 + $0x7] sm:$0x1]   ;;  %v57_v1 = vld [vmem:[%s113_s0 + $0x5] sm:$0x1]   ;;  %v56_v2 = vld [vmem:[%s113_s0 + $0x6] sm:$0x1]  }
   0x2   :  { %7 = vrot.lane.b32.xlu0 %v55_v0, %s69_s10  ;;  %19 = vrot.lane.b32.xlu1 %v57_v1, %s70_s11  ;;  %v58_v3 = vld [vmem:[%s113_s0 + $0x4] sm:$0x1]   ;;  %v2_v4 = vld [vmem:[%s113_s0] sm:$0x1]   ;;  %s71_s18 = smov 48   ;;  %s72_s19 = smov 32  }
   0x3   :  { %4 = vst.msk [vmem:[#allocation0] sm:$0x1] %vm3_vm0, %v2_v4   ;;  %v59_v5 = vld [vmem:[%s113_s0 + $0x3] sm:$0x1]   ;;  %v60_v6 = vld [vmem:[%s113_s0 + $0x2] sm:$0x1]  }
   0x4   :  { %s73_s24 = smov 24   ;;  %s74_s25 = smov 16   ;;  %v61_v7 = vld [vmem:[%s113_s0 + $0x1] sm:$0x1]   ;;  %vm27_vm4 = vcmask 326912   ;;  %vm33_vm5 = vcmask 261312  }
   0x5   :  { %s75_s0 = smov 8   ;;  %vm39_vm6 = vcmask 195712   ;;  %vm45_vm7 = vcmask 130112  }
   0x6   :  { %13 = vrot.lane.b32.xlu0 %v56_v2, %s71_s18  ;;  %25 = vrot.lane.b32.xlu1 %v58_v3, %s72_s19 }
   0xa   :  { %31 = vrot.lane.b32.xlu0 %v59_v5, %s73_s24  ;;  %37 = vrot.lane.b32.xlu1 %v60_v6, %s74_s25 }
   0xe   :  { %43 = vrot.lane.b32.xlu0 %v61_v7, %s75_s0 }
  0x74   :  { %v8_v8 = vpop.permute.xlu0 %7   ;;  %v20_v9 = vpop.permute.xlu1 %19  }
  0x75   :  { %10 = vst.msk [vmem:[#allocation0] sm:$0x1] %vm9_vm1, %v8_v8  }
  0x78   :  { %v14_v10 = vpop.permute.xlu0 %13   ;;  %v26_v11 = vpop.permute.xlu1 %25  }
  0x79   :  { %16 = vst.msk [vmem:[#allocation0] sm:$0x1] %vm15_vm2, %v14_v10  }
  0x7a   :  { %22 = vst.msk [vmem:[#allocation0] sm:$0x1] %vm21_vm3, %v20_v9  }
  0x7b   :  { %28 = vst.msk [vmem:[#allocation0] sm:$0x1] %vm27_vm4, %v26_v11  }
  0x7c   :  { %v32_v12 = vpop.permute.xlu0 %31   ;;  %v38_v13 = vpop.permute.xlu1 %37  }
  0x7d   :  { %34 = vst.msk [vmem:[#allocation0] sm:$0x1] %vm33_vm5, %v32_v12  }
  0x7e   :  { %40 = vst.msk [vmem:[#allocation0] sm:$0x1] %vm39_vm6, %v38_v13  }
  0x80   :  { %v44_v14 = vpop.permute.xlu0 %43  }
  0x81   :  { %46 = vst.msk [vmem:[#allocation0] sm:$0x1] %vm45_vm7, %v44_v14  }
  0x88   :  { %v51_v15 = vld [vmem:[#allocation0] sm:$0x1] }
  0x89   :  { %54 = vst [vmem:[%s114_s1] sm:$0x1] %v51_v15 }

// kernel: tile.8
= control target key start
LH: loop header
LB: loop body
LE: loop exit
PB: predicated region body
PF: predicated region fallthrough
CT: control target
= control target key end

     0   :  { %s22_s0 = inlined_call_operand.vmem [shape: f32[8], index: 0, kind: input, shape index: {}]   ;;  %s23_s1 = inlined_call_operand.vmem [shape: f32[8,8], index: 1, kind: output, shape index: {}]  }
   0x1   :  { %v4_v0 = vld [vmem:[%s22_s0] ss:$0 sm:$0xff] }
   0x2   :  { %5 = vst [vmem:[%s23_s1] sm:$0xff] %v4_v0 }

// kernel: upsampling_deconv_forward.1
= control target key start
LH: loop header
LB: loop body
LE: loop exit
PB: predicated region body
PF: predicated region fallthrough
CT: control target
= control target key end

     0   :  { %s731_s12 = smov 0   ;;  %s733_s13 = smov 0   ;;  %s845_s0 = inlined_call_operand.vmem [shape: f32[2,512,4], index: 0, kind: input, shape index: {}]   ;;  %s846_s1 = inlined_call_operand.vmem [shape: f32[4,64], index: 1, kind: input, shape index: {}]   ;;  %s847_s2 = inlined_call_operand.vmem [shape: f32[1,64], index: 2, kind: input, shape index: {}]   ;;  %s848_s3 = inlined_call_operand.vmem [shape: f32[2,512,64], index: 3, kind: output, shape index: {}]  }
   0x1   :  { %s735_s14 = smov 0   ;;  %s737_s15 = smov 0  }
   0x2   :  { %s739_s16 = smov 0  }
   0x3 LB: > { %s22_s17 = sadd.s32 1, %s701_s14  ;;  %s25_s18 = sadd.s32 1, %s705_s15  ;;  %s709_s16 = sphi %s739_s16, %s13_s16   ;;  %s705_s15 = sphi %s737_s15, %s852_s15   ;;  %s701_s14 = sphi %s735_s14, %s851_s14   ;;  %s697_s13 = sphi %s733_s13, %s850_s13   ;;  %s693_s12 = sphi %s731_s12, %s849_s12  }
   0x4   : > { %p23_p0 = scmp.ge.s32.totalorder %s22_s17, 4  ;;  %p559_p1 = scmp.ge.s32.totalorder %s709_s16, 1 }
   0x5   : > { %p158_p2 = scmp.lt.s32.totalorder %s709_s16, 9 }
   0x6   : > { %s854_s17 = smov (%p23_p0, %s22_s17), 0  ;;  %s856_s18 = smov (!%p23_p0, %s25_s18), %s705_s15 }
   0x7   : > { %p159_p3 = pnand %p559_p1, %p158_p2  ;;  %p27_p4 = scmp.ge.s32.totalorder %s856_s18, 2 }
   0x8   : > { %s560_s21 = sshll.u32 (!%p159_p3), %s693_s12, 4  ;;  %p191_p5 = scmp.lt.s32.totalorder (!%p159_p3), %s697_s13, 1 }
   0x9   : > { %s858_s18 = smov (%p27_p4, %s856_s18), 0  ;;  %162 = sbr.rel (%p159_p3) target bundleno = 234 (0xea), region = 32 }
   0xa   : > { %p193_p6 = scmp.lt.s32.totalorder (!%p159_p3), %s560_s21, 63 }
   0xe   : > { %v226_v0 = vld [vmem:[%s846_s1] sm:$0xf]  ;;  %vm283_vm0 = vcmask 1043456   ;;  %s860_s13 = smov (!%p191_p5, %s697_s13), 1  ;;  %s862_s21 = smov (!%p193_p6, %s560_s21), 63  ;;  %vm234_vm1 = vcmask 31744  }
   0xf   : > { %603 = vmatprep.subr.msk.mxu0 %vm283_vm0, %v226_v0  ;;  %629 = vmatprep.subr.msk.mxu1 %vm283_vm0, %v226_v0  ;;  %s561_s22 = sshll.u32 %s860_s13, 6  ;;  %v566_v17 = vld [vmem:[%s847_s2] ss:$0 sm:$0xff]  ;;  %vm448_vm2 = vcmask 523264  }
  0x10   : > { %604 = vmatpush3.msk.msra.mxu0 %vm283_vm0, %v226_v0  ;;  %630 = vmatpush3.msk.msra.mxu1 %vm283_vm0, %v226_v0  ;;  %s764_s23 = sadd.s32 %s561_s22, %s862_s21 }
  0x11   : > { %s562_s24 = sshll.u32 %s764_s23, 3 }
  0x12   : > { %s198_s27 = scalar_lea.vmem %s845_s0, %s562_s24  ;;  %s796_s5 = scalar_lea.vmem %s848_s3, %s562_s24 }
  0x13   : > { %v210_v1 = vld [vmem:[%s198_s27] sm:$0xff]  ;;  %v211_v3 = vld [vmem:[%s198_s27 + $0x8] sm:$0xff]  ;;  %v212_v5 = vld [vmem:[%s198_s27 + $0x10] sm:$0xff] }
  0x14   : > { %v218_v2 = vld [vmem:[%s198_s27 + $0x40] sm:$0xff]  ;;  %605 = vmatprep.mubr.msk.f32.mxu0 %vm234_vm1, %v210_v1  ;;  %v219_v4 = vld [vmem:[%s198_s27 + $0x48] sm:$0xff]  ;;  %v220_v6 = vld [vmem:[%s198_s27 + $0x50] sm:$0xff] }
  0x15   : > { %617 = vmatprep.mubr.msk.f32.mxu1 %vm234_vm1, %v218_v2  ;;  %606 = vmatmul.mubr.msk.f32.vlgmr.msra.gmra.mxu0 %vm234_vm1, %v211_v3  ;;  %v213_v7 = vld [vmem:[%s198_s27 + $0x18] sm:$0xff]  ;;  %v214_v9 = vld [vmem:[%s198_s27 + $0x20] sm:$0xff]  ;;  %v215_v11 = vld [vmem:[%s198_s27 + $0x28] sm:$0xff] }
  0x16   : > { %618 = vmatmul.mubr.msk.f32.vlgmr.msra.gmra.mxu1 %vm234_vm1, %v219_v4  ;;  %608 = vmatprep.mubr.msk.f32.mxu0 %vm234_vm1, %v212_v5  ;;  %v221_v8 = vld [vmem:[%s198_s27 + $0x58] sm:$0xff]  ;;  %v222_v10 = vld [vmem:[%s198_s27 + $0x60] sm:$0xff]  ;;  %v223_v12 = vld [vmem:[%s198_s27 + $0x68] sm:$0xff] }
  0x17   : > { %620 = vmatprep.mubr.msk.f32.mxu1 %vm234_vm1, %v220_v6  ;;  %v216_v13 = vld [vmem:[%s198_s27 + $0x30] sm:$0xff]  ;;  %v217_v15 = vld [vmem:[%s198_s27 + $0x38] sm:$0xff] }
  0x18   : > { %v224_v14 = vld [vmem:[%s198_s27 + $0x70] sm:$0xff]  ;;  %v225_v16 = vld [vmem:[%s198_s27 + $0x78] sm:$0xff] }
  0x19   : > { %609 = vmatmul.mubr.msk.f32.gmra.mxu0 %vm234_vm1, %v213_v7 }
  0x1a   : > { %621 = vmatmul.mubr.msk.f32.gmra.mxu1 %vm234_vm1, %v221_v8  ;;  %611 = vmatprep.mubr.msk.f32.mxu0 %vm234_vm1, %v214_v9 }
  0x1b   : > { %623 = vmatprep.mubr.msk.f32.mxu1 %vm234_vm1, %v222_v10 }
  0x1d   : > { %612 = vmatmul.mubr.msk.f32.gmra.mxu0 %vm234_vm1, %v215_v11 }
  0x1e   : > { %624 = vmatmul.mubr.msk.f32.gmra.mxu1 %vm234_vm1, %v223_v12  ;;  %614 = vmatprep.mubr.msk.f32.mxu0 %vm234_vm1, %v216_v13 }
  0x1f   : > { %626 = vmatprep.mubr.msk.f32.mxu1 %vm234_vm1, %v224_v14 }
  0x21   : > { %615 = vmatmul.mubr.msk.f32.gmra.mxu0 %vm234_vm1, %v217_v15 }
  0x22   : > { %627 = vmatmul.mubr.msk.f32.gmra.mxu1 %vm234_vm1, %v225_v16 }
  0xd5   : > { %v607_v18 = vpop.f32.mrf.mxu0 }
  0xd6   : > { %v619_v19 = vpop.f32.mrf.mxu1  ;;  %v359_v20 = vadd.f32 %v607_v18, %v566_v17 }
  0xd7   : > { %v399_v21 = vadd.f32 %v619_v19, %v566_v17  ;;  %v353_v22 = vpop.f32.mrf.mxu0 }
  0xd8   : > { %v393_v23 = vpop.f32.mrf.mxu1  ;;  %v433_v24 = vmax.f32 %v359_v20, 0.0  ;;  %v354_v26 = vadd.f32 %v566_v17, %v353_v22 }
  0xd9   : > { %v441_v25 = vmax.f32 %v399_v21, 0.0  ;;  %v394_v27 = vadd.f32 %v566_v17, %v393_v23  ;;  %v610_v28 = vpop.f32.mrf.mxu0 }
  0xda   : > { %v622_v29 = vpop.f32.mrf.mxu1  ;;  %450 = vst.msk [vmem:[%s796_s5 + $0x8] sm:$0xff] %vm448_vm2, %v433_v24  ;;  %v432_v30 = vmax.f32 %v354_v26, 0.0  ;;  %v369_v32 = vadd.f32 %v610_v28, %v566_v17 }
  0xdb   : > { %458 = vst.msk [vmem:[%s796_s5 + $0x48] sm:$0xff] %vm448_vm2, %v441_v25  ;;  %v440_v31 = vmax.f32 %v394_v27, 0.0  ;;  %v409_v33 = vadd.f32 %v622_v29, %v566_v17  ;;  %v363_v34 = vpop.f32.mrf.mxu0 }
  0xdc   : > { %v403_v35 = vpop.f32.mrf.mxu1  ;;  %449 = vst.msk [vmem:[%s796_s5] sm:$0xff] %vm448_vm2, %v432_v30  ;;  %v435_v36 = vmax.f32 %v369_v32, 0.0  ;;  %v364_v38 = vadd.f32 %v566_v17, %v363_v34 }
  0xdd   : > { %457 = vst.msk [vmem:[%s796_s5 + $0x40] sm:$0xff] %vm448_vm2, %v440_v31  ;;  %v443_v37 = vmax.f32 %v409_v33, 0.0  ;;  %v404_v39 = vadd.f32 %v566_v17, %v403_v35  ;;  %v613_v40 = vpop.f32.mrf.mxu0 }
  0xde   : > { %v625_v41 = vpop.f32.mrf.mxu1  ;;  %452 = vst.msk [vmem:[%s796_s5 + $0x18] sm:$0xff] %vm448_vm2, %v435_v36  ;;  %v434_v42 = vmax.f32 %v364_v38, 0.0  ;;  %v379_v44 = vadd.f32 %v613_v40, %v566_v17 }
  0xdf   : > { %460 = vst.msk [vmem:[%s796_s5 + $0x58] sm:$0xff] %vm448_vm2, %v443_v37  ;;  %v442_v43 = vmax.f32 %v404_v39, 0.0  ;;  %v419_v45 = vadd.f32 %v625_v41, %v566_v17  ;;  %v373_v46 = vpop.f32.mrf.mxu0 }
  0xe0   : > { %v413_v47 = vpop.f32.mrf.mxu1  ;;  %451 = vst.msk [vmem:[%s796_s5 + $0x10] sm:$0xff] %vm448_vm2, %v434_v42  ;;  %v437_v48 = vmax.f32 %v379_v44, 0.0  ;;  %v374_v50 = vadd.f32 %v566_v17, %v373_v46 }
  0xe1   : > { %459 = vst.msk [vmem:[%s796_s5 + $0x50] sm:$0xff] %vm448_vm2, %v442_v43  ;;  %v445_v49 = vmax.f32 %v419_v45, 0.0  ;;  %v414_v51 = vadd.f32 %v566_v17, %v413_v47  ;;  %v616_v52 = vpop.f32.mrf.mxu0 }
  0xe2   : > { %v628_v53 = vpop.f32.mrf.mxu1  ;;  %454 = vst.msk [vmem:[%s796_s5 + $0x28] sm:$0xff] %vm448_vm2, %v437_v48  ;;  %v436_v54 = vmax.f32 %v374_v50, 0.0  ;;  %v389_v56 = vadd.f32 %v616_v52, %v566_v17 }
  0xe3   : > { %462 = vst.msk [vmem:[%s796_s5 + $0x68] sm:$0xff] %vm448_vm2, %v445_v49  ;;  %v444_v55 = vmax.f32 %v414_v51, 0.0  ;;  %v429_v57 = vadd.f32 %v628_v53, %v566_v17  ;;  %v383_v58 = vpop.f32.mrf.mxu0 }
  0xe4   : > { %v423_v59 = vpop.f32.mrf.mxu1  ;;  %453 = vst.msk [vmem:[%s796_s5 + $0x20] sm:$0xff] %vm448_vm2, %v436_v54  ;;  %v439_v60 = vmax.f32 %v389_v56, 0.0  ;;  %v384_v62 = vadd.f32 %v566_v17, %v383_v58 }
  0xe5   : > { %461 = vst.msk [vmem:[%s796_s5 + $0x60] sm:$0xff] %vm448_vm2, %v444_v55  ;;  %v447_v61 = vmax.f32 %v429_v57, 0.0  ;;  %v424_v63 = vadd.f32 %v566_v17, %v423_v59 }
  0xe6   : > { %456 = vst.msk [vmem:[%s796_s5 + $0x38] sm:$0xff] %vm448_vm2, %v439_v60  ;;  %v438_v0 = vmax.f32 %v384_v62, 0.0 }
  0xe7   : > { %464 = vst.msk [vmem:[%s796_s5 + $0x78] sm:$0xff] %vm448_vm2, %v447_v61  ;;  %v446_v1 = vmax.f32 %v424_v63, 0.0 }
  0xe8   : > { %455 = vst.msk [vmem:[%s796_s5 + $0x30] sm:$0xff] %vm448_vm2, %v438_v0 }
  0xe9   : > { %463 = vst.msk [vmem:[%s796_s5 + $0x70] sm:$0xff] %vm448_vm2, %v446_v1 }
  0xea PF: > { %s13_s16 = sadd.s32 1, %s709_s16   ;;  %s849_s12 = smov %s701_s14 }
  0xeb   : > { %p10_p7 = scmp.ge.s32.totalorder %s13_s16, 10   ;;  %s850_s13 = smov %s705_s15 }
  0xec   : > { %s851_s14 = smov %s854_s17  ;;  %s852_s15 = smov %s858_s18 }
  0xed   :  { %12 = sbr.rel (!%p10_p7) target bundleno = 3 (0x3), region = 62 }

</bundles_post_ra>
